<compile_context>
chip_gen: v7x
topology: tpu7x:2x2x1
jax: 0.10.0
libtpu: 0.0.40
codegen_flags: <defaults>
</compile_context>

<pallas_src>
import functools

import jax
import jax.numpy as jnp
from jax.experimental import pallas as pl
from jax.experimental.pallas import tpu as pltpu


def _round_up(n, m):
    return ((n + m - 1) // m) * m


def _lane_pad(d):
    # v6e/v7x MXU tiles are 256 wide: use 256 alignment once the dim is large
    # enough that the extra zero-padding is negligible; 128 (native on v5e,
    # fine everywhere) otherwise.
    return _round_up(d, 256) if d >= 512 else _round_up(d, 128)


# ---------------------------------------------------------------------------
# Kernel: h = relu(x @ W1 + b1); h = relu(h @ W2 + b2); out = h @ W3 + b3
# (BN1 folded into W1/b1, BN2 folded into W2/b2 by the wrapper.)
# bf16 operands into the MXU, f32 accumulation / bias / ReLU.
# ---------------------------------------------------------------------------
def _mlp_kernel(x_ref, w1_ref, b1_ref, w2_ref, b2_ref, w3_ref, b3_ref, o_ref):
    h = jnp.dot(x_ref[...], w1_ref[...], preferred_element_type=jnp.float32)
    h = jnp.maximum(h + b1_ref[...], 0.0)

    h = jnp.dot(h.astype(jnp.bfloat16), w2_ref[...],
                preferred_element_type=jnp.float32)
    h = jnp.maximum(h + b2_ref[...], 0.0)

    o = jnp.dot(h.astype(jnp.bfloat16), w3_ref[...],
                preferred_element_type=jnp.float32)
    o_ref[...] = (o + b3_ref[...]).astype(o_ref.dtype)


@functools.partial(jax.jit, static_argnames=("block_b",))
def mlp_pallas(x, params, *, block_b=512):
    """x: (B, in_features) f32. params: folded+padded (W1,b1,W2,b2,W3,b3).

    Returns (B, out_padded) f32 where out_padded is the 128-lane-padded output
    width; consumers slice [:, :output_size] (padded lanes are exactly zero).
    """
    w1, b1, w2, b2, w3, b3 = params
    B, in_f = x.shape
    assert w1.shape[0] == in_f
    hid_p = w1.shape[1]
    out_p = w3.shape[1]

    # bf16 activation stream (halves the x HBM->VMEM DMA); accumulation is f32.
    x = x.astype(jnp.bfloat16)

    # Batch tile: 16-row aligned (bf16 packs 2 rows per sublane).  Keep the
    # grid length >= 2 when possible so the "parallel" batch axis can shard
    # across both TensorCores on v7x (no effect on v5e/v6e, 1 TC per chip).
    b_aligned = _round_up(B, 16)
    tile_b = max(16, min(block_b, _round_up(pl.cdiv(b_aligned, 2), 16)))
    b_pad = _round_up(B, tile_b)
    if b_pad != B:
        x = jnp.pad(x, ((0, b_pad - B), (0, 0)))
    grid = (b_pad // tile_b,)

    def _resident(shape):
        # Grid-invariant operand: single buffer (never re-fetched across the
        # batch grid), saving VMEM vs the default double-buffering.
        return pl.BlockSpec(shape, lambda i: (0, 0),
                            pipeline_mode=pl.Buffered(1))

    # Explicit VMEM budget (v5e scoped default is only 16 MiB; v7x physical is
    # 64 MiB).  Weights single-buffered bf16, x/out double-buffered.
    weight_bytes = (in_f * hid_p + hid_p * hid_p + hid_p * out_p) * 2
    bias_bytes = (2 * hid_p + out_p) * 4
    stream_bytes = 2 * tile_b * in_f * 2 + 2 * tile_b * out_p * 4
    interm_bytes = 3 * tile_b * hid_p * 4  # headroom for f32 intermediates
    footprint = weight_bytes + bias_bytes + stream_bytes + interm_bytes + (4 << 20)
    vmem_limit = int(min(max(32 << 20, _round_up(footprint, 1 << 20)), 128 << 20))
    # TODO(synk): if hidden_size grows past ~3K (bf16) the resident-weight
    # scheme exceeds v7x's 64 MiB VMEM; add a K/N-tiled "arbitrary" grid axis
    # over W2 with an f32 VMEM accumulator instead of keeping it resident.

    out = pl.pallas_call(
        _mlp_kernel,
        out_shape=jax.ShapeDtypeStruct((b_pad, out_p), jnp.float32),
        grid_spec=pltpu.PrefetchScalarGridSpec(
            num_scalar_prefetch=0,
            grid=grid,
            in_specs=[
                pl.BlockSpec((tile_b, in_f), lambda i: (i, 0)),  # x tile (bf16)
                _resident((in_f, hid_p)),                        # W1 (BN1 folded)
                _resident((1, hid_p)),                           # b1 (f32)
                _resident((hid_p, hid_p)),                       # W2 (BN2 folded)
                _resident((1, hid_p)),                           # b2 (f32)
                _resident((hid_p, out_p)),                       # W3
                _resident((1, out_p)),                           # b3 (f32)
            ],
            out_specs=pl.BlockSpec((tile_b, out_p), lambda i: (i, 0)),
        ),
        compiler_params=pltpu.CompilerParams(
            dimension_semantics=("parallel",),
            vmem_limit_bytes=vmem_limit),
    )(x, w1, b1, w2, b2, w3, b3)

    # Row-slice off batch padding only; the lane-padded columns are returned
    # as-is (they are exactly zero) so we avoid an extra full-array HBM pass.
    return out if b_pad == B else out[:B]


# ---------------------------------------------------------------------------
# Parameter construction (PyTorch-equivalent raw params), BN folding + padding
# ---------------------------------------------------------------------------
def init_raw_params(key, input_size, hidden_size, output_size, eps=1e-5):
    ks = jax.random.split(key, 14)

    def linear(kw, kb, fan_in, fan_out):
        bound = 1.0 / jnp.sqrt(fan_in)
        w = jax.random.uniform(kw, (fan_out, fan_in), jnp.float32, -bound, bound)
        b = jax.random.uniform(kb, (fan_out,), jnp.float32, -bound, bound)
        return w, b

    def batchnorm(kg, kb, km, kv, feat):
        gamma = jax.random.uniform(kg, (feat,), jnp.float32, 0.5, 1.5)
        beta = jax.random.uniform(kb, (feat,), jnp.float32, -0.5, 0.5)
        r_mean = jax.random.uniform(km, (feat,), jnp.float32, -0.1, 0.1)
        r_var = jax.random.uniform(kv, (feat,), jnp.float32, 0.5, 1.5)
        return gamma, beta, r_mean, r_var

    bn1 = batchnorm(ks[0], ks[1], ks[2], ks[3], input_size)
    bn2 = batchnorm(ks[4], ks[5], ks[6], ks[7], hidden_size)
    w1, b1 = linear(ks[8], ks[9], input_size, hidden_size)
    w2, b2 = linear(ks[10], ks[11], hidden_size, hidden_size)
    w3, b3 = linear(ks[12], ks[13], hidden_size, output_size)
    return dict(bn1=bn1, bn2=bn2, fc1=(w1, b1), fc2=(w2, b2), fc3=(w3, b3),
                eps=eps)


def fold_and_pad_params(raw):
    """Fold BN1 into fc1 and BN2 into fc2 (f32), transpose weights to (in, out),
    lane-pad hidden/output dims, then cast weights (only) to bf16."""
    eps = raw["eps"]
    g1, be1, m1, v1 = raw["bn1"]
    g2, be2, m2, v2 = raw["bn2"]
    w1, b1 = raw["fc1"]
    w2, b2 = raw["fc2"]
    w3, b3 = raw["fc3"]

    s1 = g1 / jnp.sqrt(v1 + eps)
    t1 = be1 - m1 * s1
    s2 = g2 / jnp.sqrt(v2 + eps)
    t2 = be2 - m2 * s2

    w1t, w2t, w3t = w1.T, w2.T, w3.T  # (in, out) layout for the kernel

    # bn1 then fc1:  (x*s1 + t1) @ W1 + b1  =  x @ (s1[:,None]*W1) + (t1@W1 + b1)
    W1 = s1[:, None] * w1t
    B1 = t1 @ w1t + b1
    # fc2 then bn2:  (h @ W2 + b2)*s2 + t2  =  h @ (W2*s2) + (b2*s2 + t2)
    W2 = w2t * s2[None, :]
    B2 = b2 * s2 + t2
    W3, B3 = w3t, b3

    in_f = W1.shape[0]                 # streamed x keeps its true feature dim
    hid_p = _lane_pad(W1.shape[1])
    out_p = _lane_pad(W3.shape[1])

    def pad2(a, rows, cols):
        return jnp.pad(a, ((0, rows - a.shape[0]), (0, cols - a.shape[1])))

    def pad_row(v, cols):
        return jnp.pad(v.reshape(1, -1), ((0, 0), (0, cols - v.shape[0])))

    # Zero padding keeps results exact: padded rows/cols contribute 0 and
    # relu(0) = 0, so no garbage leaks into valid lanes.  Weights are cast to
    # bf16 AFTER the BN fold (per review); biases stay f32.
    return (pad2(W1, in_f, hid_p).astype(jnp.bfloat16), pad_row(B1, hid_p),
            pad2(W2, hid_p, hid_p).astype(jnp.bfloat16), pad_row(B2, hid_p),
            pad2(W3, hid_p, out_p).astype(jnp.bfloat16), pad_row(B3, out_p))


def mlp_reference(x, raw):
    """Unfolded f32 reference matching the PyTorch forward (inference-mode BN)."""
    eps = raw["eps"]
    g1, be1, m1, v1 = raw["bn1"]
    g2, be2, m2, v2 = raw["bn2"]
    w1, b1 = raw["fc1"]
    w2, b2 = raw["fc2"]
    w3, b3 = raw["fc3"]

    h = (x - m1) / jnp.sqrt(v1 + eps) * g1 + be1
    h = jnp.maximum(h @ w1.T + b1, 0.0)
    h = h @ w2.T + b2
    h = (h - m2) / jnp.sqrt(v2 + eps) * g2 + be2
    h = jnp.maximum(h, 0.0)
    return h @ w3.T + b3


if __name__ == "__main__":
    input_size, hidden_size, output_size = 16, 32, 8
    batch = 8

    key = jax.random.PRNGKey(0)
    k_x, k_p = jax.random.split(key)
    x = jax.random.normal(k_x, (batch, input_size), jnp.float32)

    raw = init_raw_params(k_p, input_size, hidden_size, output_size)
    params = fold_and_pad_params(raw)

    out_padded = mlp_pallas(x, params)
    out_padded = jax.block_until_ready(out_padded)
    out = out_padded[:, :output_size]   # lane padding left to the consumer

    ref = mlp_reference(x, raw)
    assert out.shape == (batch, output_size)
    # bf16 MXU path vs f32 reference -> relaxed tolerance.
    assert jnp.allclose(out, ref, atol=1e-1, rtol=1e-1), "mismatch vs reference"

    print("KERNEL_OK")
</pallas_src>

<mosaic_0001>
module attributes {stable_mosaic.version = 11 : i64} {
  func.func @_mlp_kernel(%arg0: i32, %arg1: memref<16x16xbf16, #tpu.memory_space<vmem>>, %arg2: memref<16x128xbf16, #tpu.memory_space<vmem>>, %arg3: memref<1x128xf32, #tpu.memory_space<vmem>>, %arg4: memref<128x128xbf16, #tpu.memory_space<vmem>>, %arg5: memref<1x128xf32, #tpu.memory_space<vmem>>, %arg6: memref<128x128xbf16, #tpu.memory_space<vmem>>, %arg7: memref<1x128xf32, #tpu.memory_space<vmem>>, %arg8: memref<16x128xf32, #tpu.memory_space<vmem>>) attributes {dimension_semantics = [#tpu.dimension_semantics<parallel>], iteration_bounds = array<i64: 1>, scalar_prefetch = 0 : i64, scratch_operands = 0 : i64, tpu.core_type = #tpu.core_type<tc>, window_params = [{transform_indices = @transform_0, window_bounds = array<i64: 16, 16>}, {pipeline_mode = #tpu.pipeline_mode<synchronous>, transform_indices = @transform_1, window_bounds = array<i64: 16, 128>}, {pipeline_mode = #tpu.pipeline_mode<synchronous>, transform_indices = @transform_2, window_bounds = array<i64: 1, 128>}, {pipeline_mode = #tpu.pipeline_mode<synchronous>, transform_indices = @transform_3, window_bounds = array<i64: 128, 128>}, {pipeline_mode = #tpu.pipeline_mode<synchronous>, transform_indices = @transform_4, window_bounds = array<i64: 1, 128>}, {pipeline_mode = #tpu.pipeline_mode<synchronous>, transform_indices = @transform_5, window_bounds = array<i64: 128, 128>}, {pipeline_mode = #tpu.pipeline_mode<synchronous>, transform_indices = @transform_6, window_bounds = array<i64: 1, 128>}, {transform_indices = @transform_7, window_bounds = array<i64: 16, 128>}]} {
    %c0 = arith.constant 0 : index
    %c0_0 = arith.constant 0 : index
    %0 = vector.load %arg1[%c0, %c0_0] : memref<16x16xbf16, #tpu.memory_space<vmem>>, vector<16x16xbf16>
    %c0_1 = arith.constant 0 : index
    %c0_2 = arith.constant 0 : index
    %1 = vector.load %arg2[%c0_1, %c0_2] : memref<16x128xbf16, #tpu.memory_space<vmem>>, vector<16x128xbf16>
    %cst = arith.constant dense<0.000000e+00> : vector<16x128xf32>
    %2 = tpu.matmul %0, %1, %cst {dimension_numbers = #tpu.dot_dimension_numbers<[1], [0], [0], [1], [0, 0, 1, 1], [], []>} : vector<16x16xbf16>, vector<16x128xbf16>, vector<16x128xf32> -> vector<16x128xf32>
    %c0_3 = arith.constant 0 : index
    %c0_4 = arith.constant 0 : index
    %3 = vector.load %arg3[%c0_3, %c0_4] : memref<1x128xf32, #tpu.memory_space<vmem>>, vector<1x128xf32>
    %4 = vector.broadcast %3 : vector<1x128xf32> to vector<16x128xf32>
    %5 = arith.addf %2, %4 : vector<16x128xf32>
    %cst_5 = arith.constant 0.000000e+00 : f32
    %6 = vector.broadcast %cst_5 : f32 to vector<16x128xf32>
    %7 = arith.maximumf %5, %6 : vector<16x128xf32>
    %8 = arith.truncf %7 : vector<16x128xf32> to vector<16x128xbf16>
    %c0_6 = arith.constant 0 : index
    %c0_7 = arith.constant 0 : index
    %9 = vector.load %arg4[%c0_6, %c0_7] : memref<128x128xbf16, #tpu.memory_space<vmem>>, vector<128x128xbf16>
    %cst_8 = arith.constant dense<0.000000e+00> : vector<16x128xf32>
    %10 = tpu.matmul %8, %9, %cst_8 {dimension_numbers = #tpu.dot_dimension_numbers<[1], [0], [0], [1], [0, 0, 1, 1], [], []>} : vector<16x128xbf16>, vector<128x128xbf16>, vector<16x128xf32> -> vector<16x128xf32>
    %c0_9 = arith.constant 0 : index
    %c0_10 = arith.constant 0 : index
    %11 = vector.load %arg5[%c0_9, %c0_10] : memref<1x128xf32, #tpu.memory_space<vmem>>, vector<1x128xf32>
    %12 = vector.broadcast %11 : vector<1x128xf32> to vector<16x128xf32>
    %13 = arith.addf %10, %12 : vector<16x128xf32>
    %cst_11 = arith.constant 0.000000e+00 : f32
    %14 = vector.broadcast %cst_11 : f32 to vector<16x128xf32>
    %15 = arith.maximumf %13, %14 : vector<16x128xf32>
    %16 = arith.truncf %15 : vector<16x128xf32> to vector<16x128xbf16>
    %c0_12 = arith.constant 0 : index
    %c0_13 = arith.constant 0 : index
    %17 = vector.load %arg6[%c0_12, %c0_13] : memref<128x128xbf16, #tpu.memory_space<vmem>>, vector<128x128xbf16>
    %cst_14 = arith.constant dense<0.000000e+00> : vector<16x128xf32>
    %18 = tpu.matmul %16, %17, %cst_14 {dimension_numbers = #tpu.dot_dimension_numbers<[1], [0], [0], [1], [0, 0, 1, 1], [], []>} : vector<16x128xbf16>, vector<128x128xbf16>, vector<16x128xf32> -> vector<16x128xf32>
    %c0_15 = arith.constant 0 : index
    %c0_16 = arith.constant 0 : index
    %19 = vector.load %arg7[%c0_15, %c0_16] : memref<1x128xf32, #tpu.memory_space<vmem>>, vector<1x128xf32>
    %20 = vector.broadcast %19 : vector<1x128xf32> to vector<16x128xf32>
    %21 = arith.addf %18, %20 : vector<16x128xf32>
    %c0_17 = arith.constant 0 : index
    %c0_18 = arith.constant 0 : index
    %22 = vector.load %arg8[%c0_17, %c0_18] : memref<16x128xf32, #tpu.memory_space<vmem>>, vector<16x128xf32>
    tpu.vector_store %arg8[%c0_17, %c0_18], %21 {strides = array<i32>} : memref<16x128xf32, #tpu.memory_space<vmem>>, vector<16x128xf32>,
    return
  }
  func.func @transform_0(%arg0: i32) -> (i32, i32) {
    %c0_i32 = arith.constant 0 : i32
    %c0_i32_0 = arith.constant 0 : i32
    return %arg0, %c0_i32 : i32, i32
  }
  func.func @transform_1(%arg0: i32) -> (i32, i32) {
    %c0_i32 = arith.constant 0 : i32
    %c0_i32_0 = arith.constant 0 : i32
    %c0_i32_1 = arith.constant 0 : i32
    return %c0_i32, %c0_i32_0 : i32, i32
  }
  func.func @transform_2(%arg0: i32) -> (i32, i32) {
    %c0_i32 = arith.constant 0 : i32
    %c0_i32_0 = arith.constant 0 : i32
    %c0_i32_1 = arith.constant 0 : i32
    return %c0_i32, %c0_i32_0 : i32, i32
  }
  func.func @transform_3(%arg0: i32) -> (i32, i32) {
    %c0_i32 = arith.constant 0 : i32
    %c0_i32_0 = arith.constant 0 : i32
    %c0_i32_1 = arith.constant 0 : i32
    return %c0_i32, %c0_i32_0 : i32, i32
  }
  func.func @transform_4(%arg0: i32) -> (i32, i32) {
    %c0_i32 = arith.constant 0 : i32
    %c0_i32_0 = arith.constant 0 : i32
    %c0_i32_1 = arith.constant 0 : i32
    return %c0_i32, %c0_i32_0 : i32, i32
  }
  func.func @transform_5(%arg0: i32) -> (i32, i32) {
    %c0_i32 = arith.constant 0 : i32
    %c0_i32_0 = arith.constant 0 : i32
    %c0_i32_1 = arith.constant 0 : i32
    return %c0_i32, %c0_i32_0 : i32, i32
  }
  func.func @transform_6(%arg0: i32) -> (i32, i32) {
    %c0_i32 = arith.constant 0 : i32
    %c0_i32_0 = arith.constant 0 : i32
    %c0_i32_1 = arith.constant 0 : i32
    return %c0_i32, %c0_i32_0 : i32, i32
  }
  func.func @transform_7(%arg0: i32) -> (i32, i32) {
    %c0_i32 = arith.constant 0 : i32
    %c0_i32_0 = arith.constant 0 : i32
    return %arg0, %c0_i32 : i32, i32
  }
}

</mosaic_0001>

<bundles_post_ra>
// kernel: mlp_pallas.1
= control target key start
LH: loop header
LB: loop body
LE: loop exit
PB: predicated region body
PF: predicated region fallthrough
CT: control target
= control target key end

     0   :  { %12 = vsyncpa [#allocation3], 0  ;;  %s631_s0 = inlined_call_operand.vmem [shape: bf16[16,16], index: 0, kind: input, shape index: {}]   ;;  %s632_s1 = inlined_call_operand.vmem [shape: bf16[16,128], index: 1, kind: input, shape index: {}]   ;;  %s633_s2 = inlined_call_operand.vmem [shape: f32[1,128], index: 2, kind: input, shape index: {}]   ;;  %s634_s3 = inlined_call_operand.hbm [shape: bf16[128,128], index: 3, kind: input, shape index: {}]   ;;  %s635_s4 = inlined_call_operand.vmem [shape: f32[1,128], index: 4, kind: input, shape index: {}]   ;;  %s636_s5 = inlined_call_operand.hbm [shape: bf16[128,128], index: 5, kind: input, shape index: {}]   ;;  %s637_s6 = inlined_call_operand.vmem [shape: f32[1,128], index: 6, kind: input, shape index: {}]   ;;  %s638_s7 = inlined_call_operand.vmem [shape: f32[16,128], index: 7, kind: output, shape index: {}]  }
   0x1   :  { %13 = vsyncpa [#allocation5], 0  ;;  %s520_s24 = smov [#allocation2]   ;;  %s472_s28 = scalar_lea.hbm %s634_s3, 1024 }
   0x2   :  { %s25_s25 = sshll.u32 %s520_s24, 4  ;;  %p473_p0 = scmp.ne.s32.totalorder %s634_s3, %s472_s28  ;;  %s26_s25 = int_to_ptr.vmem [resolvable:$true] %s25_s25 }
   0x3   :  { %p476_p1 = scmp.lt.u32.totalorder %s472_s28, %s634_s3 }
   0x5   :  { %p478_p2 = pnand %p476_p1, %p473_p0 }
   0x7   :  { %481 = shalt.err (!%p478_p2)
}
   0x8   :  { %s482_s10 = scalar_lea.vmem %s26_s25, 1024  ;;  %p487_p4 = scmp.lt.s32.totalorder %s26_s25, %s26_s25 }
   0x9   :  { %p483_p3 = scmp.ne.s32.totalorder %s26_s25, %s482_s10  ;;  %p488_p5 = scmp.lt.s32.totalorder %s482_s10, %s482_s10 }
   0xb   :  { %p489_p6 = por %p488_p5, %p487_p4 }
   0xd   :  { %p490_p7 = pnand %p489_p6, %p483_p3 }
   0xf   :  { %493 = shalt.err (!%p490_p7)
}
  0x10   :  { %s521_s11 = smov 64   ;;  %s522_s12 = smov 4  }
  0x11   :  { %31 = dma.hbm_to_vmem [thread:$0]  %s634_s3, 1024, %s26_s25, [#allocation3], %s521_s11, %s521_s11, %s522_s12  }
  0x12   :  { %s523_s15 = smov [#allocation4]   ;;  %s494_s19 = scalar_lea.hbm %s636_s5, 1024 }
  0x13   :  { %s39_s16 = sshll.u32 %s523_s15, 4  ;;  %p495_p8 = scmp.ne.s32.totalorder %s636_s5, %s494_s19  ;;  %s40_s16 = int_to_ptr.vmem [resolvable:$true] %s39_s16 }
  0x14   :  { %p498_p9 = scmp.lt.u32.totalorder %s494_s19, %s636_s5 }
  0x16   :  { %p500_p10 = pnand %p498_p9, %p495_p8 }
  0x18   :  { %503 = shalt.err (!%p500_p10)
}
  0x19   :  { %s504_s24 = scalar_lea.vmem %s40_s16, 1024  ;;  %p509_p12 = scmp.lt.s32.totalorder %s40_s16, %s40_s16 }
  0x1a   :  { %p505_p11 = scmp.ne.s32.totalorder %s40_s16, %s504_s24  ;;  %p510_p13 = scmp.lt.s32.totalorder %s504_s24, %s504_s24 }
  0x1c   :  { %p511_p0 = por %p510_p13, %p509_p12 }
  0x1e   :  { %p512_p1 = pnand %p511_p0, %p505_p11 }
  0x20   :  { %515 = shalt.err (!%p512_p1)
}
  0x21   :  { %45 = dma.hbm_to_vmem [thread:$0]  %s636_s5, 1024, %s40_s16, [#allocation5], %s521_s11, %s521_s11, %s522_s12  }
  0x22   :  { %516 = dma.done.wait [#allocation3], 1024  }
  0x23   :  { %517 = vsyncadd [#allocation3], 4294966272 }
  0x24   :  { %518 = dma.done.wait [#allocation5], 1024  }
  0x25   :  { %519 = vsyncadd [#allocation5], 4294966272  ;;  %v524_v0 = vmov 0.0   ;;  %vm525_vm0 = vmmov 0   ;;  %v454_v1 = vld [vmem:[%s632_s1] sm:$0xff]   ;;  %vm77_vm1 = vcmask 130048  }
  0x26   :  { %402 = vmatprep.subr.bf16.mxu0 %v524_v0  ;;  %404 = vmatprep.mubr.msk.bf16.mxu0 %vm525_vm0, %v524_v0  ;;  %v455_v2 = vld [vmem:[%s631_s0] sm:$0xff]   ;;  %v457_v4 = vld [vmem:[#allocation2 + $0x8] sm:$0xff]   ;;  %v458_v5 = vld [vmem:[#allocation2 + $0x10] sm:$0xff]  }
  0x27   :  { %408 = vmatprep.subr.bf16.mxu1 %v524_v0  ;;  %424 = vmatprep.mubr.msk.bf16.mxu1 %vm525_vm0, %v524_v0  ;;  %v456_v3 = vld [vmem:[#allocation2] sm:$0xff]   ;;  %v459_v6 = vld [vmem:[#allocation2 + $0x18] sm:$0xff]   ;;  %v461_v8 = vld [vmem:[#allocation2 + $0x28] sm:$0xff]  }
  0x28   :  { %403 = vmatpush3.bf16.msra.mxu0 %v454_v1  ;;  %409 = vmatpush3.bf16.msra.mxu1 %v456_v3  ;;  %v460_v7 = vld [vmem:[#allocation2 + $0x20] sm:$0xff]   ;;  %v462_v9 = vld [vmem:[#allocation2 + $0x30] sm:$0xff]   ;;  %v463_v10 = vld [vmem:[#allocation2 + $0x38] sm:$0xff]  }
  0x29   :  { %428 = vmatprep.subr.bf16.mxu0 %v524_v0  ;;  %410 = vmatprep.subr.bf16.mxu1 %v524_v0  ;;  %v464_v11 = vld [vmem:[#allocation4] sm:$0xff]   ;;  %v465_v12 = vld [vmem:[#allocation4 + $0x8] sm:$0xff]   ;;  %v466_v13 = vld [vmem:[#allocation4 + $0x10] sm:$0xff]  }
  0x2a   :  { %v467_v14 = vld [vmem:[#allocation4 + $0x18] sm:$0xff]   ;;  %v468_v15 = vld [vmem:[#allocation4 + $0x20] sm:$0xff]   ;;  %v469_v16 = vld [vmem:[#allocation4 + $0x28] sm:$0xff]  }
  0x2b   :  { %405 = vmatmul.mubr.msk.bf16.vlgmr.msra.gmra.mrb[0].mxu0 %vm77_vm1, %v455_v2  ;;  %v360_v17 = vld [vmem:[%s633_s2] ss:$0 sm:$0xff]  ;;  %v470_v27 = vld [vmem:[#allocation4 + $0x30] sm:$0xff]   ;;  %v471_v28 = vld [vmem:[#allocation4 + $0x38] sm:$0xff]  }
  0x2c   :  { %444 = vmatprep.mubr.msk.bf16.mxu0 %vm525_vm0, %v524_v0  ;;  %411 = vmatpush3.bf16.msra.mxu1 %v457_v4  ;;  %v364_v29 = vld [vmem:[%s635_s4] ss:$0 sm:$0xff] }
  0x2d   :  { %412 = vmatprep.subr.bf16.mxu1 %v524_v0  ;;  %429 = vmatpush3.bf16.msra.mxu0 %v464_v11  ;;  %v373_v39 = vld [vmem:[%s637_s6] ss:$0 sm:$0xff] }
  0x2e   :  { %430 = vmatprep.subr.bf16.mxu0 %v524_v0 }
  0x30   :  { %413 = vmatpush3.bf16.msra.mxu1 %v458_v5 }
  0x31   :  { %414 = vmatprep.subr.bf16.mxu1 %v524_v0  ;;  %431 = vmatpush3.bf16.msra.mxu0 %v465_v12 }
  0x32   :  { %432 = vmatprep.subr.bf16.mxu0 %v524_v0 }
  0x34   :  { %415 = vmatpush3.bf16.msra.mxu1 %v459_v6 }
  0x35   :  { %416 = vmatprep.subr.bf16.mxu1 %v524_v0  ;;  %433 = vmatpush3.bf16.msra.mxu0 %v466_v13 }
  0x36   :  { %434 = vmatprep.subr.bf16.mxu0 %v524_v0 }
  0x38   :  { %417 = vmatpush3.bf16.msra.mxu1 %v460_v7 }
  0x39   :  { %418 = vmatprep.subr.bf16.mxu1 %v524_v0  ;;  %435 = vmatpush3.bf16.msra.mxu0 %v467_v14 }
  0x3a   :  { %436 = vmatprep.subr.bf16.mxu0 %v524_v0 }
  0x3c   :  { %419 = vmatpush3.bf16.msra.mxu1 %v461_v8 }
  0x3d   :  { %420 = vmatprep.subr.bf16.mxu1 %v524_v0  ;;  %437 = vmatpush3.bf16.msra.mxu0 %v468_v15 }
  0x3e   :  { %438 = vmatprep.subr.bf16.mxu0 %v524_v0 }
  0x40   :  { %421 = vmatpush3.bf16.msra.mxu1 %v462_v9 }
  0x41   :  { %422 = vmatprep.subr.bf16.mxu1 %v524_v0  ;;  %439 = vmatpush3.bf16.msra.mxu0 %v469_v16 }
  0x42   :  { %440 = vmatprep.subr.bf16.mxu0 %v524_v0 }
  0x44   :  { %423 = vmatpush3.bf16.msra.mxu1 %v463_v10 }
  0x45   :  { %441 = vmatpush3.bf16.msra.mxu0 %v470_v27 }
  0x46   :  { %442 = vmatprep.subr.bf16.mxu0 %v524_v0 }
  0x49   :  { %443 = vmatpush3.bf16.msra.mxu0 %v471_v28 }
  0xfe   :  { %v115_v18 = vpop.f32.mrb[0].mxu0 }
  0xff   :  { %v116_v19 = vadd.f32 %v360_v17, %v115_v18  ;;  %v406_v20 = vpop.f32.mrb[1].mxu0 }
 0x100   :  { %v118_v21 = vpop.f32.mrb[2].mxu0 }
 0x101   :  { %v119_v22 = vadd.f32 %v360_v17, %v118_v21  ;;  %v407_v23 = vpop.f32.mrb[3].mxu0  ;;  %v122_v24 = vmax.f32 %v116_v19, 0.0 }
 0x103   :  { %v123_v25 = vmax.f32 %v119_v22, 0.0 }
 0x105   :  { %v124_v26 = vpack.c.bf16 %v123_v25, %v122_v24 }
 0x107   :  { %425 = vmatmul.mubr.bf16.vlgmr.msra.gmra.mrb[0].mxu1 %v124_v26 }
 0x1da   :  { %v230_v30 = vpop.f32.mrb[0].mxu1 }
 0x1db   :  { %v231_v31 = vadd.f32 %v364_v29, %v230_v30  ;;  %v426_v32 = vpop.f32.mrb[1].mxu1 }
 0x1dc   :  { %v233_v33 = vpop.f32.mrb[2].mxu1 }
 0x1dd   :  { %v234_v34 = vadd.f32 %v364_v29, %v233_v33  ;;  %v427_v35 = vpop.f32.mrb[3].mxu1  ;;  %v237_v36 = vmax.f32 %v231_v31, 0.0 }
 0x1df   :  { %v238_v37 = vmax.f32 %v234_v34, 0.0 }
 0x1e1   :  { %v239_v38 = vpack.c.bf16 %v238_v37, %v237_v36 }
 0x1e3   :  { %445 = vmatmul.mubr.bf16.vlgmr.msra.gmra.mrb[4].mxu0 %v239_v38 }
 0x2b6   :  { %v345_v40 = vpop.f32.mrb[4].mxu0 }
 0x2b7   :  { %v346_v41 = vadd.f32 %v373_v39, %v345_v40  ;;  %v446_v42 = vpop.f32.mrb[5].mxu0 }
 0x2b8   :  { %v348_v43 = vpop.f32.mrb[6].mxu0 }
 0x2b9   :  { %352 = vst [vmem:[%s638_s7] sm:$0xff] %v346_v41  ;;  %v349_v44 = vadd.f32 %v373_v39, %v348_v43  ;;  %v447_v45 = vpop.f32.mrb[7].mxu0 }
 0x2bb   :  { %353 = vst [vmem:[%s638_s7 + $0x8] sm:$0xff] %v349_v44 }
 0x2bc   :  { %358 = vsyncpa [#allocation3], 1 }
 0x2bd   :  { %359 = vsyncpa [#allocation5], 1 }

</bundles_post_ra>
